<compile_context>
chip_gen: v5e
topology: v5e:2x2
jax: 0.10.0
libtpu: 0.0.40
codegen_flags: <defaults>
</compile_context>

<pallas_src>
import functools
import math

import jax
import jax.numpy as jnp
from jax.experimental import pallas as pl
from jax.experimental.pallas import tpu as pltpu


def _round_up(x: int, m: int) -> int:
    return (x + m - 1) // m * m


# ---------------------------------------------------------------------------
# Kernels
# ---------------------------------------------------------------------------

def _split_poisson_stride_kernel(scale_ref, nh1_ref, x_ref, out_ref):
    """out = scale * (x[:, 0::2] - x[:, 1::2]) + (-H1), all batch-major.

    scale_ref: (1, 1)     SMEM  2/alpha
    nh1_ref:   (1, TM)    VMEM  -H.sum(-1) tile (batch independent)
    x_ref:     (TB, 2*TM) VMEM  raw split measurements (lane-interleaved +/-)
    out_ref:   (TB, TM)   VMEM  lane-dense output tile
    """
    tm = out_ref.shape[-1]
    y_pos = x_ref[:, pl.ds(0, tm, stride=2)]   # x[..., 0::2]
    y_neg = x_ref[:, pl.ds(1, tm, stride=2)]   # x[..., 1::2]
    out_ref[...] = scale_ref[0, 0] * (y_pos - y_neg) + nh1_ref[...]


def _split_poisson_planes_kernel(scale_ref, nh1_ref, pos_ref, neg_ref, out_ref):
    """Fallback: measurements arrive as two contiguous (TB, TM) planes."""
    out_ref[...] = scale_ref[0, 0] * (pos_ref[...] - neg_ref[...]) + nh1_ref[...]


# ---------------------------------------------------------------------------
# One-time capability probe: does Mosaic lower a lane-dim stride-2 load?
# ---------------------------------------------------------------------------

@functools.lru_cache(maxsize=None)
def _lane_stride_deinterleave_ok() -> bool:
    try:
        bp, mp = 8, 256
        x = jax.random.normal(jax.random.PRNGKey(1), (bp, 2 * mp), jnp.float32)

        def _probe_kernel(x_ref, o_ref):
            o_ref[...] = (x_ref[:, pl.ds(0, mp, stride=2)]
                          - x_ref[:, pl.ds(1, mp, stride=2)])

        out = pl.pallas_call(
            _probe_kernel,
            out_shape=jax.ShapeDtypeStruct((bp, mp), jnp.float32),
            grid=(1,),
            in_specs=[pl.BlockSpec((bp, 2 * mp), lambda i: (0, 0))],
            out_specs=pl.BlockSpec((bp, mp), lambda i: (0, 0)),
        )(x)
        ref = x[:, 0::2] - x[:, 1::2]
        return bool(jnp.allclose(out, ref, atol=1e-6, rtol=1e-6))
    except Exception:
        return False


# ---------------------------------------------------------------------------
# Tiling / wrapper
# ---------------------------------------------------------------------------

def _pick_tiles(B: int, M: int) -> tuple[int, int]:
    # Measurement (lane) tile: full M when it fits, else 2048-wide aligned
    # tiles (x block = 2*tm lanes, ~4 MiB f32).  Batch (sublane) tile: full B
    # when small, else 256.  Blocks that are smaller than the array are always
    # (8, 128)-aligned, so no host-side padding is ever needed.
    tm = M if M <= 2048 else 2048
    tb = B if B <= 256 else 256
    # v7x megacore: ensure >= 2 grid blocks whenever the problem is big enough
    # to split along an (8, 128)-aligned boundary.
    if pl.cdiv(B, tb) * pl.cdiv(M, tm) == 1:
        if M > 128:
            tm_half = _round_up(pl.cdiv(M, 2), 128)
            if tm_half < M:
                tm = tm_half
        elif B > 8:
            tb_half = _round_up(pl.cdiv(B, 2), 8)
            if tb_half < B:
                tb = tb_half
    return tb, tm


def _forward_2d(x2: jax.Array, neg_h1: jax.Array, scale: jax.Array) -> jax.Array:
    B, twoM = x2.shape
    M = twoM // 2
    tb, tm = _pick_tiles(B, M)
    grid = (pl.cdiv(B, tb), pl.cdiv(M, tm))

    itemsize = jnp.dtype(x2.dtype).itemsize
    cost = pl.CostEstimate(
        flops=3 * B * M,                                   # sub, mul, add
        transcendentals=0,
        bytes_accessed=(B * 2 * M + M + B * M) * itemsize,
    )
    cparams = pltpu.CompilerParams(
        dimension_semantics=("parallel", "parallel"),      # megacore-shardable
        vmem_limit_bytes=32 * 1024 * 1024,
    )
    smem_spec = pl.BlockSpec(memory_space=pltpu.MemorySpace.SMEM)
    nh1_spec = pl.BlockSpec((1, tm), lambda i, j: (0, j))
    out_spec = pl.BlockSpec((tb, tm), lambda i, j: (i, j))
    out_shape = jax.ShapeDtypeStruct((B, M), x2.dtype)

    if _lane_stride_deinterleave_ok():
        # In-kernel de-interleave via lane-strided loads: one HBM read of x,
        # one HBM write of out, no scratch, no XLU transposes -> HBM roofline.
        x_spec = pl.BlockSpec((tb, 2 * tm), lambda i, j: (i, j))
        try:
            return pl.pallas_call(
                _split_poisson_stride_kernel,
                out_shape=out_shape,
                grid=grid,
                in_specs=[smem_spec, nh1_spec, x_spec],
                out_specs=out_spec,
                compiler_params=cparams,
                cost_estimate=cost,
            )(scale, neg_h1, x2)
        except Exception:
            pass  # fall through to the robust two-plane path

    # Fallback: XLA de-interleaves into two contiguous planes (one extra HBM
    # pass) and the kernel is a pure 2-load / 1-FMA / 1-store elementwise op.
    x3 = x2.reshape(B, M, 2)
    pos, neg = x3[..., 0], x3[..., 1]
    plane_spec = pl.BlockSpec((tb, tm), lambda i, j: (i, j))
    return pl.pallas_call(
        _split_poisson_planes_kernel,
        out_shape=out_shape,
        grid=grid,
        in_specs=[smem_spec, nh1_spec, plane_spec, plane_spec],
        out_specs=out_spec,
        compiler_params=cparams,
        cost_estimate=cost,
    )(scale, neg_h1, pos, neg)


# ---------------------------------------------------------------------------
# Public API
# ---------------------------------------------------------------------------

def make_neg_H1(H: jax.Array) -> jax.Array:
    """-H.sum(-1) as a (1, M) f32 vector.  Compute once and cache."""
    return (-jnp.sum(jnp.asarray(H, jnp.float32), axis=-1)).reshape(1, -1)


def split_poisson_forward(x: jax.Array, neg_h1: jax.Array, alpha) -> jax.Array:
    """SplitPoisson.forward: x (*, 2M) f32 -> (*, M) f32.

    `neg_h1` is the cached -H.sum(-1) vector (see make_neg_H1); `alpha` is the
    image intensity (python float or scalar array, no recompile across values).
    """
    x = jnp.asarray(x)
    if x.dtype != jnp.float32:
        # The lane-layout tricks assume f32 (8,128) tiling.
        raise NotImplementedError("SplitPoisson Pallas kernel expects float32 input")
    *batch, twoM = x.shape
    if twoM % 2:
        raise ValueError("last dimension of x must be 2*M")
    M = twoM // 2
    neg_h1 = jnp.asarray(neg_h1, x.dtype).reshape(1, M)
    scale = jnp.reshape(jnp.asarray(2.0 / alpha, dtype=x.dtype), (1, 1))

    B = math.prod(batch)
    out2 = _forward_2d(x.reshape(B, twoM), neg_h1, scale)
    return out2.reshape(*batch, M)


class SplitPoissonTPU:
    """Pallas-TPU equivalent of spyrit.core.prep.SplitPoisson (forward only).

    Caches -H.sum(-1) at construction so forward() never touches the (M, N)
    measurement matrix (its row-sum is batch independent).
    """

    def __init__(self, alpha, H=None, H_ones=None):
        if H_ones is None:
            if H is None:
                raise ValueError("provide either H or H_ones")
            H_ones = jnp.sum(jnp.asarray(H, jnp.float32), axis=-1)
        self.alpha = alpha
        self.neg_H1 = (-jnp.asarray(H_ones, jnp.float32)).reshape(1, -1)
        self.M = self.neg_H1.shape[-1]

    def forward(self, x: jax.Array) -> jax.Array:
        return split_poisson_forward(x, self.neg_H1, self.alpha)

    __call__ = forward


if __name__ == "__main__":
    # Small shapes consistent with the module: images h=w=16 -> N=256,
    # M=64 measurements -> x has 2M=128 entries per batch element.
    B = 2
    h = w = 16
    N = h * w
    M = 64
    alpha = 10.0

    key = jax.random.PRNGKey(0)
    kx, kh = jax.random.split(key)
    x = jax.random.uniform(kx, (B, 2 * M), dtype=jnp.float32)   # raw split measurements
    H = jax.random.uniform(kh, (M, N), dtype=jnp.float32)       # measurement matrix

    prep = SplitPoissonTPU(alpha, H=H)
    out = jax.block_until_ready(prep(x))

    # Pure-JAX reference of the PyTorch forward.
    ref = 2.0 * (x[:, 0::2] - x[:, 1::2]) / alpha - jnp.sum(H, axis=-1)[None, :]

    assert out.shape == (B, M), out.shape
    assert out.dtype == jnp.float32
    assert jnp.allclose(out, ref, atol=1e-5, rtol=1e-5), float(jnp.max(jnp.abs(out - ref)))

    print("KERNEL_OK")
</pallas_src>

<mosaic_0001>
module attributes {stable_mosaic.version = 11 : i64} {
  func.func @_probe_kernel(%arg0: i32, %arg1: memref<8x512xf32, #tpu.memory_space<vmem>>, %arg2: memref<8x256xf32, #tpu.memory_space<vmem>>) attributes {dimension_semantics = [#tpu.dimension_semantics<arbitrary>], iteration_bounds = array<i64: 1>, scalar_prefetch = 0 : i64, scratch_operands = 0 : i64, tpu.core_type = #tpu.core_type<tc>, window_params = [{pipeline_mode = #tpu.pipeline_mode<synchronous>, transform_indices = @transform_0, window_bounds = array<i64: 8, 512>}, {pipeline_mode = #tpu.pipeline_mode<synchronous>, transform_indices = @transform_1, window_bounds = array<i64: 8, 256>}]} {
    %c0 = arith.constant 0 : index
    %c0_0 = arith.constant 0 : index
    %0 = tpu.strided_load %arg1[%c0, %c0_0] {strides = array<i32: 1, 2>} : memref<8x512xf32, #tpu.memory_space<vmem>>, vector<8x256xf32>
    %c0_1 = arith.constant 0 : index
    %c1 = arith.constant 1 : index
    %1 = tpu.strided_load %arg1[%c0_1, %c1] {strides = array<i32: 1, 2>} : memref<8x512xf32, #tpu.memory_space<vmem>>, vector<8x256xf32>
    %2 = arith.subf %0, %1 : vector<8x256xf32>
    %c0_2 = arith.constant 0 : index
    %c0_3 = arith.constant 0 : index
    %3 = vector.load %arg2[%c0_2, %c0_3] : memref<8x256xf32, #tpu.memory_space<vmem>>, vector<8x256xf32>
    tpu.vector_store %arg2[%c0_2, %c0_3], %2 {strides = array<i32>} : memref<8x256xf32, #tpu.memory_space<vmem>>, vector<8x256xf32>,
    return
  }
  func.func @transform_0(%arg0: i32) -> (i32, i32) {
    %c0_i32 = arith.constant 0 : i32
    %c0_i32_0 = arith.constant 0 : i32
    %c0_i32_1 = arith.constant 0 : i32
    return %c0_i32, %c0_i32_0 : i32, i32
  }
  func.func @transform_1(%arg0: i32) -> (i32, i32) {
    %c0_i32 = arith.constant 0 : i32
    %c0_i32_0 = arith.constant 0 : i32
    %c0_i32_1 = arith.constant 0 : i32
    return %c0_i32, %c0_i32_0 : i32, i32
  }
}

module attributes {stable_mosaic.version = 11 : i64} {
  func.func @_split_poisson_planes_kernel(%arg0: i32, %arg1: i32, %arg2: memref<1x1xf32, #tpu.memory_space<smem>>, %arg3: memref<1x64xf32, #tpu.memory_space<vmem>>, %arg4: memref<2x64xf32, #tpu.memory_space<vmem>>, %arg5: memref<2x64xf32, #tpu.memory_space<vmem>>, %arg6: memref<2x64xf32, #tpu.memory_space<vmem>>) attributes {dimension_semantics = [#tpu.dimension_semantics<parallel>, #tpu.dimension_semantics<parallel>], iteration_bounds = array<i64: 1, 1>, scalar_prefetch = 0 : i64, scratch_operands = 0 : i64, tpu.core_type = #tpu.core_type<tc>, window_params = [{transform_indices = @transform_0, window_bounds = array<i64: 1, 1>}, {transform_indices = @transform_1, window_bounds = array<i64: 1, 64>}, {transform_indices = @transform_2, window_bounds = array<i64: 2, 64>}, {transform_indices = @transform_3, window_bounds = array<i64: 2, 64>}, {transform_indices = @transform_4, window_bounds = array<i64: 2, 64>}]} {
    %c0 = arith.constant 0 : index
    %c0_0 = arith.constant 0 : index
    %0 = memref.load %arg2[%c0, %c0_0] : memref<1x1xf32, #tpu.memory_space<smem>>
    %c0_1 = arith.constant 0 : index
    %c0_2 = arith.constant 0 : index
    %1 = vector.load %arg4[%c0_1, %c0_2] : memref<2x64xf32, #tpu.memory_space<vmem>>, vector<2x64xf32>
    %c0_3 = arith.constant 0 : index
    %c0_4 = arith.constant 0 : index
    %2 = vector.load %arg5[%c0_3, %c0_4] : memref<2x64xf32, #tpu.memory_space<vmem>>, vector<2x64xf32>
    %3 = arith.subf %1, %2 : vector<2x64xf32>
    %4 = vector.broadcast %0 : f32 to vector<2x64xf32>
    %5 = arith.mulf %4, %3 : vector<2x64xf32>
    %c0_5 = arith.constant 0 : index
    %c0_6 = arith.constant 0 : index
    %6 = vector.load %arg3[%c0_5, %c0_6] : memref<1x64xf32, #tpu.memory_space<vmem>>, vector<1x64xf32>
    %7 = vector.broadcast %6 : vector<1x64xf32> to vector<2x64xf32>
    %8 = arith.addf %5, %7 : vector<2x64xf32>
    %c0_7 = arith.constant 0 : index
    %c0_8 = arith.constant 0 : index
    %9 = vector.load %arg6[%c0_7, %c0_8] : memref<2x64xf32, #tpu.memory_space<vmem>>, vector<2x64xf32>
    tpu.vector_store %arg6[%c0_7, %c0_8], %8 {strides = array<i32>} : memref<2x64xf32, #tpu.memory_space<vmem>>, vector<2x64xf32>,
    return
  }
  func.func @transform_0(%arg0: i32, %arg1: i32) -> (i32, i32) {
    %c0_i32 = arith.constant 0 : i32
    %c0_i32_0 = arith.constant 0 : i32
    %c0_i32_1 = arith.constant 0 : i32
    return %c0_i32, %c0_i32_0 : i32, i32
  }
  func.func @transform_1(%arg0: i32, %arg1: i32) -> (i32, i32) {
    %c0_i32 = arith.constant 0 : i32
    %c0_i32_0 = arith.constant 0 : i32
    return %c0_i32, %arg1 : i32, i32
  }
  func.func @transform_2(%arg0: i32, %arg1: i32) -> (i32, i32) {
    %c0_i32 = arith.constant 0 : i32
    return %arg0, %arg1 : i32, i32
  }
  func.func @transform_3(%arg0: i32, %arg1: i32) -> (i32, i32) {
    %c0_i32 = arith.constant 0 : i32
    return %arg0, %arg1 : i32, i32
  }
  func.func @transform_4(%arg0: i32, %arg1: i32) -> (i32, i32) {
    %c0_i32 = arith.constant 0 : i32
    return %arg0, %arg1 : i32, i32
  }
}

</mosaic_0001>

<bundles_post_ra>
// kernel: tpu_custom_call.1
= control target key start
LH: loop header
LB: loop body
LE: loop exit
PB: predicated region body
PF: predicated region fallthrough
CT: control target
= control target key end

     0   :  { %10 = vsyncpa [#allocation4], 0  ;;  %s203_s0 = inlined_call_operand.<no memory space> [shape: f32[1,1], index: 0, kind: input, shape index: {}]   ;;  %s204_s1 = inlined_call_operand.hbm [shape: f32[1,64], index: 1, kind: input, shape index: {}]   ;;  %s205_s2 = inlined_call_operand.vmem [shape: f32[2,64], index: 2, kind: input, shape index: {}]   ;;  %s206_s3 = inlined_call_operand.hbm [shape: f32[2,64], index: 3, kind: input, shape index: {}]   ;;  %s207_s4 = inlined_call_operand.hbm [shape: f32[2,64], index: 4, kind: output, shape index: {}]  }
   0x1   :  { %11 = vsyncpa [#allocation7], 0 }
   0x2   :  { %12 = vsyncpa [#allocation5], 0  ;;  %s20_s17 = sshll.u32 %s204_s1, 4  ;;  %s160_s18 = smov [#allocation3]   ;;  %s21_s17 = int_to_ptr.hbm [resolvable:$true] %s20_s17 }
   0x3   :  { %s22_s19 = sshll.u32 %s160_s18, 4  ;;  %s33_s22 = sshll.u32 %s206_s3, 4  ;;  %s23_s19 = int_to_ptr.vmem [resolvable:$true] %s22_s19  ;;  %s34_s22 = int_to_ptr.hbm [resolvable:$true] %s33_s22 }
   0x4   :  { %25 = dma.hbm_to_vmem [thread:$0]  %s21_s17, 16, %s23_s19, [#allocation4]  }
   0x5   :  { %s161_s23 = smov [#allocation6]  }
   0x6   :  { %s35_s24 = sshll.u32 %s161_s23, 4  ;;  %s36_s24 = int_to_ptr.vmem [resolvable:$true] %s35_s24 }
   0x7   :  { %38 = dma.hbm_to_vmem [thread:$0]  %s34_s22, 32, %s36_s24, [#allocation7]  }
   0x8   :  { %154 = dma.done.wait [#allocation4], 16  }
   0x9   :  { %155 = vsyncadd [#allocation4], 4294967280 }
   0xa   :  { %156 = dma.done.wait [#allocation7], 32  }
   0xb   :  { %157 = vsyncadd [#allocation7], 4294967264  ;;  %v48_v0 = vld [vmem:[%s205_s2] sm:$0x3]  ;;  %v49_v1 = vld [vmem:[#allocation6] sm:$0x3]  ;;  %v51_v2 = vstv %s203_s0 }
   0xc   :  { %v50_v3 = vsub.f32 %v48_v0, %v49_v1  ;;  %v81_v4 = vld [vmem:[#allocation3] ss:$0 sm:$0xff]  ;;  %s162_s3 = smov [#allocation8]   ;;  %s67_s5 = sshll.u32 %s207_s4, 4  ;;  %vm58_vm0 = vcmask 517120   ;;  %s68_s5 = int_to_ptr.hbm [resolvable:$true] %s67_s5 }
   0xd   :  { %s65_s28 = sshll.u32 %s162_s3, 4  ;;  %s66_s28 = int_to_ptr.vmem [resolvable:$true] %s65_s28 }
   0xe   :  { %v52_v5 = vmul.f32 %v51_v2, %v50_v3 }
  0x10   :  { %v57_v6 = vadd.f32 %v81_v4, %v52_v5 }
  0x12   :  { %59 = vst.msk [vmem:[#allocation8] sm:$0x3] %vm58_vm0, %v57_v6 }
  0x13   :  { %70 = dma.vmem_to_hbm [thread:$0]  %s66_s28, 32, %s68_s5, [#allocation5]  }
  0x14   :  { %158 = dma.done.wait [#allocation5], 32  }
  0x15   :  { %159 = vsyncadd [#allocation5], 4294967264 }
  0x16   :  { %75 = vsyncpa [#allocation4], 1 }
  0x17   :  { %76 = vsyncpa [#allocation7], 1 }
  0x18   :  { %77 = vsyncpa [#allocation5], 1 }

</bundles_post_ra>
